<compile_context>
chip_gen: v7x
topology: tpu7x:2x2x1
jax: 0.10.0
libtpu: 0.0.40
codegen_flags: <defaults>
</compile_context>

<pallas_src>
import functools

import jax
import jax.numpy as jnp
from jax import lax
from jax.experimental import pallas as pl
from jax.experimental.pallas import tpu as pltpu


def _round_up(v, m):
    return (v + m - 1) // m * m


def _global_sa_kernel(ptr_ref, tfirst_ref, tlast_ref,          # scalar prefetch (SMEM)
                      x_ref, pos_ref, w1x_ref, w1p_ref, b1_ref, w2_ref, b2_ref,
                      out_ref, acc_ref, *, tile_n, num_graphs):
    """Fused MLP + sorted-segment max pool over one tile of points.

    ptr_ref    : [B+1]  int32  row offsets of each graph (batch is sorted)
    tfirst_ref : [T]    int32  graph id of the first row of tile t
    tlast_ref  : [T]    int32  graph id of the last row of tile t (B => padding)
    x_ref      : [tile_n, C]   bf16
    pos_ref    : [tile_n, 3]   bf16
    w1x_ref    : [C, H1]  f32,  w1p_ref: [3, H1] f32,  b1_ref: [1, H1] f32
    w2_ref     : [H1, H2_pad] f32, b2_ref: [1, H2_pad] f32
    out_ref    : [B_pad, 1, H2_pad] f32   (written once, on the last tile)
    acc_ref    : [B_pad, 1, H2_pad] f32   VMEM accumulator (persists over grid)
    """
    i = pl.program_id(0)

    @pl.when(i == 0)
    def _init():
        acc_ref[...] = jnp.full(acc_ref.shape, -jnp.inf, dtype=acc_ref.dtype)

    # --- MLP hot path: MXU matmuls (f32 accumulate) + VPU relu ---
    xb = x_ref[...].astype(jnp.float32)
    pb = pos_ref[...].astype(jnp.float32)
    h = jnp.dot(xb, w1x_ref[...], preferred_element_type=jnp.float32)
    h = h + jnp.dot(pb, w1p_ref[...], preferred_element_type=jnp.float32)
    h = jnp.maximum(h + b1_ref[...], 0.0)
    f = jnp.dot(h, w2_ref[...], preferred_element_type=jnp.float32) + b2_ref[...]
    f = jnp.maximum(f, 0.0)                              # [tile_n, H2_pad] f32

    # --- segment max: only over graphs actually present in this tile ---
    rows = lax.broadcasted_iota(jnp.int32, (tile_n, 1), 0) + i * tile_n
    lo = tfirst_ref[i]
    hi = jnp.minimum(tlast_ref[i], num_graphs - 1) + 1   # padding rows have id B

    def body(b, carry):
        r0 = ptr_ref[b]
        r1 = ptr_ref[b + 1]
        mask = (rows >= r0) & (rows < r1)                # [tile_n, 1]
        seg = jnp.max(jnp.where(mask, f, -jnp.inf), axis=0, keepdims=True)
        acc_ref[b] = jnp.maximum(acc_ref[b], seg)        # dynamic leading-dim RMW
        return carry

    lax.fori_loop(lo, hi, body, 0)

    @pl.when(i == pl.num_programs(0) - 1)
    def _finalize():
        out_ref[...] = acc_ref[...]                      # single lane-dense store


def global_sa_module(x, pos, batch, params, num_graphs, *, tile_n=1024):
    """JAX wrapper reproducing GlobalSAModule.forward.

    x:     [N, C]  float32
    pos:   [N, 3]  float32
    batch: [N]     int32, SORTED graph ids in [0, num_graphs)  (PyG convention)
    params = (w1 [C+3, H1], b1 [H1], w2 [H1, H2], b2 [H2])
    Returns (pooled [B, H2], pos_zeros [B, 3], batch_out [B]).
    """
    w1, b1, w2, b2 = params
    n, c = x.shape
    p = pos.shape[1]
    h1 = w1.shape[1]
    h2 = w2.shape[1]

    tile_n = min(tile_n, _round_up(n, 16))               # bf16-friendly sublane tile
    n_pad = _round_up(n, tile_n)
    num_tiles = n_pad // tile_n
    b_pad = _round_up(num_graphs, 8)
    h2_pad = _round_up(h2, 128)                          # lane-dense output

    batch = batch.astype(jnp.int32)

    # Stream activations as bf16 (HBM-bound kernel); compute stays f32.
    x_p = jnp.pad(x, ((0, n_pad - n), (0, 0))).astype(jnp.bfloat16)
    pos_p = jnp.pad(pos, ((0, n_pad - n), (0, 0))).astype(jnp.bfloat16)

    # Split first layer so the wrapper never materializes concat([x, pos]).
    w1x = w1[:c]
    w1p = w1[c:]
    b1_2d = b1.reshape(1, h1)
    w2_p = jnp.pad(w2, ((0, 0), (0, h2_pad - h2)))
    b2_2d = jnp.pad(b2.reshape(1, h2), ((0, 0), (0, h2_pad - h2)))

    # Scalar-prefetch metadata (requires sorted batch).
    ptr = jnp.searchsorted(
        batch, jnp.arange(num_graphs + 1, dtype=jnp.int32)).astype(jnp.int32)
    bid_pad = jnp.concatenate(
        [batch, jnp.full((n_pad - n,), num_graphs, dtype=jnp.int32)])
    tfirst = bid_pad[0::tile_n]                          # [num_tiles]
    tlast = bid_pad[tile_n - 1::tile_n]                  # [num_tiles]

    kernel = functools.partial(_global_sa_kernel, tile_n=tile_n,
                               num_graphs=num_graphs)

    grid_spec = pltpu.PrefetchScalarGridSpec(
        num_scalar_prefetch=3,
        grid=(num_tiles,),
        in_specs=[
            pl.BlockSpec((tile_n, c), lambda i, pt, tf, tl: (i, 0)),
            pl.BlockSpec((tile_n, p), lambda i, pt, tf, tl: (i, 0)),
            pl.BlockSpec((c, h1), lambda i, pt, tf, tl: (0, 0)),
            pl.BlockSpec((p, h1), lambda i, pt, tf, tl: (0, 0)),
            pl.BlockSpec((1, h1), lambda i, pt, tf, tl: (0, 0)),
            pl.BlockSpec((h1, h2_pad), lambda i, pt, tf, tl: (0, 0)),
            pl.BlockSpec((1, h2_pad), lambda i, pt, tf, tl: (0, 0)),
        ],
        out_specs=pl.BlockSpec((b_pad, 1, h2_pad),
                               lambda i, pt, tf, tl: (0, 0, 0)),
        scratch_shapes=[pltpu.VMEM((b_pad, 1, h2_pad), jnp.float32)],
    )

    out = pl.pallas_call(
        kernel,
        out_shape=jax.ShapeDtypeStruct((b_pad, 1, h2_pad), jnp.float32),
        grid_spec=grid_spec,
        compiler_params=pltpu.CompilerParams(
            dimension_semantics=("arbitrary",),          # accumulator over tiles
            vmem_limit_bytes=32 * 1024 * 1024),
    )(ptr, tfirst, tlast, x_p, pos_p, w1x, w1p, b1_2d, w2_p, b2_2d)

    pooled = out.reshape(b_pad, h2_pad)[:num_graphs, :h2]
    pos_out = jnp.zeros((num_graphs, 3), dtype=pos.dtype)
    batch_out = jnp.arange(num_graphs, dtype=batch.dtype)
    return pooled, pos_out, batch_out


def _reference(x, pos, batch, params, num_graphs):
    """Pure-JAX reference (same bf16 rounding of the streamed activations)."""
    w1, b1, w2, b2 = params
    c = x.shape[1]
    xb = x.astype(jnp.bfloat16).astype(jnp.float32)
    pb = pos.astype(jnp.bfloat16).astype(jnp.float32)
    h = jnp.maximum(xb @ w1[:c] + pb @ w1[c:] + b1, 0.0)
    f = jnp.maximum(h @ w2 + b2, 0.0)
    out = jnp.full((num_graphs, f.shape[1]), -jnp.inf, dtype=f.dtype)
    out = out.at[batch].max(f)
    return out


if __name__ == "__main__":
    key = jax.random.PRNGKey(0)
    k_x, k_p, k_w1, k_b1, k_w2, k_b2 = jax.random.split(key, 6)

    # Small shapes: N=16 points, C=4 input features, 2 graphs, MLP 7 -> 32 -> 64.
    N, C, B = 16, 4, 2
    H1, H2 = 32, 64
    CIN = C + 3

    x = jax.random.normal(k_x, (N, C), dtype=jnp.float32)
    pos = jax.random.normal(k_p, (N, 3), dtype=jnp.float32)
    batch = jnp.repeat(jnp.arange(B, dtype=jnp.int32), N // B)  # sorted graph ids

    # Deterministic parameter init (synthetic "checkpoint").
    w1 = jax.random.normal(k_w1, (CIN, H1), dtype=jnp.float32) * 0.2
    b1 = jax.random.normal(k_b1, (H1,), dtype=jnp.float32) * 0.05
    w2 = jax.random.normal(k_w2, (H1, H2), dtype=jnp.float32) * 0.2
    b2 = jax.random.normal(k_b2, (H2,), dtype=jnp.float32) * 0.05
    params = (w1, b1, w2, b2)

    pooled, pos_out, batch_out = global_sa_module(x, pos, batch, params, B)
    jax.block_until_ready((pooled, pos_out, batch_out))

    ref = _reference(x, pos, batch, params, B)
    assert pooled.shape == (B, H2)
    assert pos_out.shape == (B, 3)
    assert batch_out.shape == (B,)
    assert jnp.allclose(pooled, ref, atol=1e-3, rtol=1e-3), (
        float(jnp.max(jnp.abs(pooled - ref))))

    print("KERNEL_OK")
</pallas_src>

<mosaic_0001>
module attributes {stable_mosaic.version = 11 : i64} {
  func.func @_global_sa_kernel(%arg0: i32, %arg1: memref<3xi32, #tpu.memory_space<smem>>, %arg2: memref<1xi32, #tpu.memory_space<smem>>, %arg3: memref<1xi32, #tpu.memory_space<smem>>, %arg4: memref<16x4xbf16, #tpu.memory_space<vmem>>, %arg5: memref<16x3xbf16, #tpu.memory_space<vmem>>, %arg6: memref<4x32xf32, #tpu.memory_space<vmem>>, %arg7: memref<3x32xf32, #tpu.memory_space<vmem>>, %arg8: memref<1x32xf32, #tpu.memory_space<vmem>>, %arg9: memref<32x128xf32, #tpu.memory_space<vmem>>, %arg10: memref<1x128xf32, #tpu.memory_space<vmem>>, %arg11: memref<8x1x128xf32, #tpu.memory_space<vmem>>, %arg12: memref<8x1x128xf32, #tpu.memory_space<vmem>>) attributes {dimension_semantics = [#tpu.dimension_semantics<arbitrary>], iteration_bounds = array<i64: 1>, scalar_prefetch = 3 : i64, scratch_operands = 1 : i64, tpu.core_type = #tpu.core_type<tc>, window_params = [{transform_indices = @transform_0, window_bounds = array<i64: 16, 4>}, {transform_indices = @transform_1, window_bounds = array<i64: 16, 3>}, {pipeline_mode = #tpu.pipeline_mode<synchronous>, transform_indices = @transform_2, window_bounds = array<i64: 4, 32>}, {pipeline_mode = #tpu.pipeline_mode<synchronous>, transform_indices = @transform_3, window_bounds = array<i64: 3, 32>}, {pipeline_mode = #tpu.pipeline_mode<synchronous>, transform_indices = @transform_4, window_bounds = array<i64: 1, 32>}, {pipeline_mode = #tpu.pipeline_mode<synchronous>, transform_indices = @transform_5, window_bounds = array<i64: 32, 128>}, {pipeline_mode = #tpu.pipeline_mode<synchronous>, transform_indices = @transform_6, window_bounds = array<i64: 1, 128>}, {pipeline_mode = #tpu.pipeline_mode<synchronous>, transform_indices = @transform_7, window_bounds = array<i64: 8, 1, 128>}]} {
    %c0_i32 = arith.constant 0 : i32
    %0 = arith.cmpi eq, %arg0, %c0_i32 : i32
    %1 = arith.extui %0 : i1 to i32
    %c0_i32_0 = arith.constant 0 : i32
    %2 = arith.cmpi ne, %1, %c0_i32_0 : i32
    scf.if %2 {
      %cst_23 = arith.constant 0xFF800000 : f32
      %39 = vector.broadcast %cst_23 : f32 to vector<8x1x128xf32>
      %c0_24 = arith.constant 0 : index
      %c0_25 = arith.constant 0 : index
      %c0_26 = arith.constant 0 : index
      %40 = vector.load %arg12[%c0_24, %c0_25, %c0_26] : memref<8x1x128xf32, #tpu.memory_space<vmem>>, vector<8x1x128xf32>
      tpu.vector_store %arg12[%c0_24, %c0_25, %c0_26], %39 {strides = array<i32>} : memref<8x1x128xf32, #tpu.memory_space<vmem>>, vector<8x1x128xf32>,
    } else {
    }
    %c0 = arith.constant 0 : index
    %c0_1 = arith.constant 0 : index
    %3 = vector.load %arg4[%c0, %c0_1] : memref<16x4xbf16, #tpu.memory_space<vmem>>, vector<16x4xbf16>
    %4 = arith.extf %3 : vector<16x4xbf16> to vector<16x4xf32>
    %c0_2 = arith.constant 0 : index
    %c0_3 = arith.constant 0 : index
    %5 = vector.load %arg5[%c0_2, %c0_3] : memref<16x3xbf16, #tpu.memory_space<vmem>>, vector<16x3xbf16>
    %6 = arith.extf %5 : vector<16x3xbf16> to vector<16x3xf32>
    %c0_4 = arith.constant 0 : index
    %c0_5 = arith.constant 0 : index
    %7 = vector.load %arg6[%c0_4, %c0_5] : memref<4x32xf32, #tpu.memory_space<vmem>>, vector<4x32xf32>
    %cst = arith.constant dense<0.000000e+00> : vector<16x32xf32>
    %8 = tpu.matmul %4, %7, %cst {dimension_numbers = #tpu.dot_dimension_numbers<[1], [0], [0], [1], [0, 0, 1, 1], [], []>} : vector<16x4xf32>, vector<4x32xf32>, vector<16x32xf32> -> vector<16x32xf32>
    %c0_6 = arith.constant 0 : index
    %c0_7 = arith.constant 0 : index
    %9 = vector.load %arg7[%c0_6, %c0_7] : memref<3x32xf32, #tpu.memory_space<vmem>>, vector<3x32xf32>
    %cst_8 = arith.constant dense<0.000000e+00> : vector<16x32xf32>
    %10 = tpu.matmul %6, %9, %cst_8 {dimension_numbers = #tpu.dot_dimension_numbers<[1], [0], [0], [1], [0, 0, 1, 1], [], []>} : vector<16x3xf32>, vector<3x32xf32>, vector<16x32xf32> -> vector<16x32xf32>
    %11 = arith.addf %8, %10 : vector<16x32xf32>
    %c0_9 = arith.constant 0 : index
    %c0_10 = arith.constant 0 : index
    %12 = vector.load %arg8[%c0_9, %c0_10] : memref<1x32xf32, #tpu.memory_space<vmem>>, vector<1x32xf32>
    %13 = vector.broadcast %12 : vector<1x32xf32> to vector<16x32xf32>
    %14 = arith.addf %11, %13 : vector<16x32xf32>
    %cst_11 = arith.constant 0.000000e+00 : f32
    %15 = vector.broadcast %cst_11 : f32 to vector<16x32xf32>
    %16 = arith.maximumf %14, %15 : vector<16x32xf32>
    %c0_12 = arith.constant 0 : index
    %c0_13 = arith.constant 0 : index
    %17 = vector.load %arg9[%c0_12, %c0_13] : memref<32x128xf32, #tpu.memory_space<vmem>>, vector<32x128xf32>
    %cst_14 = arith.constant dense<0.000000e+00> : vector<16x128xf32>
    %18 = tpu.matmul %16, %17, %cst_14 {dimension_numbers = #tpu.dot_dimension_numbers<[1], [0], [0], [1], [0, 0, 1, 1], [], []>} : vector<16x32xf32>, vector<32x128xf32>, vector<16x128xf32> -> vector<16x128xf32>
    %c0_15 = arith.constant 0 : index
    %c0_16 = arith.constant 0 : index
    %19 = vector.load %arg10[%c0_15, %c0_16] : memref<1x128xf32, #tpu.memory_space<vmem>>, vector<1x128xf32>
    %20 = vector.broadcast %19 : vector<1x128xf32> to vector<16x128xf32>
    %21 = arith.addf %18, %20 : vector<16x128xf32>
    %cst_17 = arith.constant 0.000000e+00 : f32
    %22 = vector.broadcast %cst_17 : f32 to vector<16x128xf32>
    %23 = arith.maximumf %21, %22 : vector<16x128xf32>
    %24 = tpu.iota {dimensions = array<i32: 0>} : vector<16x1xi32>
    %c16_i32 = arith.constant 16 : i32
    %25 = arith.muli %arg0, %c16_i32 : i32
    %26 = vector.broadcast %25 : i32 to vector<16x1xi32>
    %27 = arith.addi %24, %26 : vector<16x1xi32>
    %28 = arith.index_cast %arg0 : i32 to index
    %29 = memref.load %arg2[%28] : memref<1xi32, #tpu.memory_space<smem>>
    %30 = arith.index_cast %arg0 : i32 to index
    %31 = memref.load %arg3[%30] : memref<1xi32, #tpu.memory_space<smem>>
    %c1_i32 = arith.constant 1 : i32
    %32 = arith.minsi %31, %c1_i32 : i32
    %c1_i32_18 = arith.constant 1 : i32
    %33 = arith.addi %32, %c1_i32_18 : i32
    %c0_i32_19 = arith.constant 0 : i32
    %34 = arith.subi %33, %29 : i32
    %35 = arith.addi %29, %34 : i32
    %c1_i32_20 = arith.constant 1 : i32
    scf.for %arg13 = %29 to %35 step %c1_i32_20  : i32 {
      %39 = arith.index_cast %arg13 : i32 to index
      %40 = memref.load %arg1[%39] : memref<3xi32, #tpu.memory_space<smem>>
      %c1_i32_23 = arith.constant 1 : i32
      %41 = arith.addi %arg13, %c1_i32_23 : i32
      %42 = arith.index_cast %41 : i32 to index
      %43 = memref.load %arg1[%42] : memref<3xi32, #tpu.memory_space<smem>>
      %44 = vector.broadcast %40 : i32 to vector<16x1xi32>
      %45 = arith.cmpi sge, %27, %44 : vector<16x1xi32>
      %46 = vector.broadcast %43 : i32 to vector<16x1xi32>
      %47 = arith.cmpi slt, %27, %46 : vector<16x1xi32>
      %48 = arith.andi %45, %47 : vector<16x1xi1>
      %cst_24 = arith.constant 0xFF800000 : f32
      %49 = vector.shape_cast %48 : vector<16x1xi1> to vector<16x1xi1>
      %50 = vector.broadcast %49 : vector<16x1xi1> to vector<16x128xi1>
      %51 = vector.broadcast %cst_24 : f32 to vector<16x128xf32>
      %52 = arith.select %50, %23, %51 : vector<16x128xi1>, vector<16x128xf32>
      %cst_25 = arith.constant dense<0xFF800000> : vector<128xf32>
      %53 = vector.multi_reduction <maximumf>, %52, %cst_25 [0] : vector<16x128xf32> to vector<128xf32>
      %54 = vector.shape_cast %53 : vector<128xf32> to vector<1x128xf32>
      %55 = arith.index_cast %arg13 : i32 to index
      %c0_26 = arith.constant 0 : index
      %c0_27 = arith.constant 0 : index
      %56 = vector.load %arg12[%55, %c0_26, %c0_27] : memref<8x1x128xf32, #tpu.memory_space<vmem>>, vector<1x1x128xf32>
      %57 = vector.shape_cast %56 : vector<1x1x128xf32> to vector<1x128xf32>
      %58 = arith.maximumf %57, %54 : vector<1x128xf32>
      %59 = arith.index_cast %arg13 : i32 to index
      %c0_28 = arith.constant 0 : index
      %c0_29 = arith.constant 0 : index
      %60 = vector.load %arg12[%59, %c0_28, %c0_29] : memref<8x1x128xf32, #tpu.memory_space<vmem>>, vector<1x1x128xf32>
      %61 = vector.shape_cast %60 : vector<1x1x128xf32> to vector<1x128xf32>
      %62 = vector.shape_cast %58 : vector<1x128xf32> to vector<1x1x128xf32>
      tpu.vector_store %arg12[%59, %c0_28, %c0_29], %62 {strides = array<i32>} : memref<8x1x128xf32, #tpu.memory_space<vmem>>, vector<1x1x128xf32>,
    }
    %c0_i32_21 = arith.constant 0 : i32
    %36 = arith.cmpi eq, %arg0, %c0_i32_21 : i32
    %37 = arith.extui %36 : i1 to i32
    %c0_i32_22 = arith.constant 0 : i32
    %38 = arith.cmpi ne, %37, %c0_i32_22 : i32
    scf.if %38 {
      %c0_23 = arith.constant 0 : index
      %c0_24 = arith.constant 0 : index
      %c0_25 = arith.constant 0 : index
      %39 = vector.load %arg12[%c0_23, %c0_24, %c0_25] : memref<8x1x128xf32, #tpu.memory_space<vmem>>, vector<8x1x128xf32>
      %c0_26 = arith.constant 0 : index
      %c0_27 = arith.constant 0 : index
      %c0_28 = arith.constant 0 : index
      %40 = vector.load %arg11[%c0_26, %c0_27, %c0_28] : memref<8x1x128xf32, #tpu.memory_space<vmem>>, vector<8x1x128xf32>
      tpu.vector_store %arg11[%c0_26, %c0_27, %c0_28], %39 {strides = array<i32>} : memref<8x1x128xf32, #tpu.memory_space<vmem>>, vector<8x1x128xf32>,
    } else {
    }
    return
  }
  func.func @transform_0(%arg0: i32, %arg1: memref<3xi32, #tpu.memory_space<smem>>, %arg2: memref<1xi32, #tpu.memory_space<smem>>, %arg3: memref<1xi32, #tpu.memory_space<smem>>) -> (i32, i32) {
    %c0_i32 = arith.constant 0 : i32
    %c0_i32_0 = arith.constant 0 : i32
    return %arg0, %c0_i32 : i32, i32
  }
  func.func @transform_1(%arg0: i32, %arg1: memref<3xi32, #tpu.memory_space<smem>>, %arg2: memref<1xi32, #tpu.memory_space<smem>>, %arg3: memref<1xi32, #tpu.memory_space<smem>>) -> (i32, i32) {
    %c0_i32 = arith.constant 0 : i32
    %c0_i32_0 = arith.constant 0 : i32
    return %arg0, %c0_i32 : i32, i32
  }
  func.func @transform_2(%arg0: i32, %arg1: memref<3xi32, #tpu.memory_space<smem>>, %arg2: memref<1xi32, #tpu.memory_space<smem>>, %arg3: memref<1xi32, #tpu.memory_space<smem>>) -> (i32, i32) {
    %c0_i32 = arith.constant 0 : i32
    %c0_i32_0 = arith.constant 0 : i32
    %c0_i32_1 = arith.constant 0 : i32
    return %c0_i32, %c0_i32_0 : i32, i32
  }
  func.func @transform_3(%arg0: i32, %arg1: memref<3xi32, #tpu.memory_space<smem>>, %arg2: memref<1xi32, #tpu.memory_space<smem>>, %arg3: memref<1xi32, #tpu.memory_space<smem>>) -> (i32, i32) {
    %c0_i32 = arith.constant 0 : i32
    %c0_i32_0 = arith.constant 0 : i32
    %c0_i32_1 = arith.constant 0 : i32
    return %c0_i32, %c0_i32_0 : i32, i32
  }
  func.func @transform_4(%arg0: i32, %arg1: memref<3xi32, #tpu.memory_space<smem>>, %arg2: memref<1xi32, #tpu.memory_space<smem>>, %arg3: memref<1xi32, #tpu.memory_space<smem>>) -> (i32, i32) {
    %c0_i32 = arith.constant 0 : i32
    %c0_i32_0 = arith.constant 0 : i32
    %c0_i32_1 = arith.constant 0 : i32
    return %c0_i32, %c0_i32_0 : i32, i32
  }
  func.func @transform_5(%arg0: i32, %arg1: memref<3xi32, #tpu.memory_space<smem>>, %arg2: memref<1xi32, #tpu.memory_space<smem>>, %arg3: memref<1xi32, #tpu.memory_space<smem>>) -> (i32, i32) {
    %c0_i32 = arith.constant 0 : i32
    %c0_i32_0 = arith.constant 0 : i32
    %c0_i32_1 = arith.constant 0 : i32
    return %c0_i32, %c0_i32_0 : i32, i32
  }
  func.func @transform_6(%arg0: i32, %arg1: memref<3xi32, #tpu.memory_space<smem>>, %arg2: memref<1xi32, #tpu.memory_space<smem>>, %arg3: memref<1xi32, #tpu.memory_space<smem>>) -> (i32, i32) {
    %c0_i32 = arith.constant 0 : i32
    %c0_i32_0 = arith.constant 0 : i32
    %c0_i32_1 = arith.constant 0 : i32
    return %c0_i32, %c0_i32_0 : i32, i32
  }
  func.func @transform_7(%arg0: i32, %arg1: memref<3xi32, #tpu.memory_space<smem>>, %arg2: memref<1xi32, #tpu.memory_space<smem>>, %arg3: memref<1xi32, #tpu.memory_space<smem>>) -> (i32, i32, i32) {
    %c0_i32 = arith.constant 0 : i32
    %c0_i32_0 = arith.constant 0 : i32
    %c0_i32_1 = arith.constant 0 : i32
    %c0_i32_2 = arith.constant 0 : i32
    return %c0_i32, %c0_i32_0, %c0_i32_1 : i32, i32, i32
  }
}

</mosaic_0001>

<bundles_post_ra>
// kernel: tpu_custom_call.1
= control target key start
LH: loop header
LB: loop body
LE: loop exit
PB: predicated region body
PF: predicated region fallthrough
CT: control target
= control target key end

     0   :  { %s676_s0 = inlined_call_operand.vmem [shape: s32[3], index: 0, kind: input, shape index: {}]   ;;  %s677_s1 = inlined_call_operand.<no memory space> [shape: s32[1], index: 1, kind: input, shape index: {}]   ;;  %s678_s2 = inlined_call_operand.<no memory space> [shape: s32[1], index: 2, kind: input, shape index: {}]   ;;  %s679_s3 = inlined_call_operand.vmem [shape: bf16[16,4], index: 3, kind: input, shape index: {}]   ;;  %s680_s4 = inlined_call_operand.vmem [shape: bf16[16,3], index: 4, kind: input, shape index: {}]   ;;  %s681_s5 = inlined_call_operand.vmem [shape: f32[4,32], index: 5, kind: input, shape index: {}]   ;;  %s682_s6 = inlined_call_operand.vmem [shape: f32[3,32], index: 6, kind: input, shape index: {}]   ;;  %s683_s7 = inlined_call_operand.vmem [shape: f32[1,32], index: 7, kind: input, shape index: {}]   ;;  %s684_s8 = inlined_call_operand.vmem [shape: f32[32,128], index: 8, kind: input, shape index: {}]   ;;  %s685_s9 = inlined_call_operand.vmem [shape: f32[1,128], index: 9, kind: input, shape index: {}]   ;;  %s686_s10 = inlined_call_operand.hbm [shape: f32[8,1,128], index: 10, kind: output, shape index: {}]  }
   0x1   :  { %s15_s15 = sshll.u32 %s676_s0, 4  ;;  %s16_s15 = int_to_ptr.vmem [resolvable:$true] %s15_s15 }
   0x2   :  { %s499_s16 = scalar_lea.vmem %s16_s15, 16  ;;  %p504_p1 = scmp.lt.s32.totalorder %s16_s15, %s16_s15 }
   0x3   :  { %p500_p0 = scmp.ne.s32.totalorder %s16_s15, %s499_s16  ;;  %p505_p2 = scmp.lt.s32.totalorder %s499_s16, %s499_s16 }
   0x5   :  { %p506_p3 = por %p505_p2, %p504_p1 }
   0x7   :  { %p507_p4 = pnand %p506_p3, %p500_p0 }
   0x9   :  { %510 = shalt.err (!%p507_p4)  }
   0xa   :  { %s545_s17 = smov [#allocation4]  }
   0xb   :  { %18 = dma.vmem_to_smem %s16_s15, 16, %s545_s17, [#allocation3] }
   0xc   :  { %537 = dma.done.wait [#allocation3], 16 }
   0xd   :  { %538 = vsyncadd [#allocation3], 4294967280 }
   0xe   :  { %22 = sfence }
   0xf   :  { %23 = vsyncpa [#allocation8], 0  ;;  %v59_v0 = vld [vmem:[%s682_s6] sm:$0x7]  ;;  %vm67_vm0 = vcmask 1042432   ;;  %v546_v1 = vmov -inf   ;;  %v338_v22 = vlaneseq }
  0x10   :  { %42 = vst [vmem:[#allocation2] sm:$0x1] %v546_v1  ;;  %43 = vst [vmem:[#allocation2 + $0x1] sm:$0x1] %v546_v1  ;;  %455 = vmatprep.subr.msk.mxu0 %vm67_vm0, %v59_v0  ;;  %v440_v2 = vld [vmem:[%s680_s4] sm:$0xff]   ;;  %vm60_vm1 = vcmask 23552  }
  0x11   :  { %44 = vst [vmem:[#allocation2 + $0x2] sm:$0x1] %v546_v1  ;;  %45 = vst [vmem:[#allocation2 + $0x3] sm:$0x1] %v546_v1  ;;  %v58_v3 = vld [vmem:[%s681_s5] sm:$0xf]  ;;  %456 = vmatpush3.msk.msra.mxu0 %vm67_vm0, %v59_v0  ;;  %v441_v5 = vunpack.c.l.bf16 %v440_v2  ;;  %v442_v6 = vunpack.c.h.bf16 %v440_v2 }
  0x12   :  { %46 = vst [vmem:[#allocation2 + $0x4] sm:$0x1] %v546_v1  ;;  %47 = vst [vmem:[#allocation2 + $0x5] sm:$0x1] %v546_v1  ;;  %vm153_vm2 = vcmask 1043456   ;;  %v436_v4 = vld [vmem:[%s679_s3] sm:$0xff]  }
  0x13   :  { %48 = vst [vmem:[#allocation2 + $0x6] sm:$0x1] %v546_v1  ;;  %49 = vst [vmem:[#allocation2 + $0x7] sm:$0x1] %v546_v1  ;;  %v437_v7 = vunpack.c.l.bf16 %v436_v4  ;;  %v243_v8 = vld [vmem:[%s684_s8] sm:$0xff]  ;;  %v244_v9 = vld [vmem:[%s684_s8 + $0x8] sm:$0xff]  ;;  %460 = vmatprep.subr.msk.mxu0 %vm153_vm2, %v58_v3  ;;  %457 = vmatprep.mubr.msk.f32.mxu0 %vm60_vm1, %v441_v5  ;;  %v438_v11 = vunpack.c.h.bf16 %v436_v4 }
  0x14   :  { %vm146_vm3 = vcmask 31744   ;;  %v476_v10 = vpack.c.bf16 %v244_v9, %v243_v8  ;;  %458 = vmatmul.mubr.msk.f32.vlgmr.msra.gmra.mrb[0].mxu0 %vm60_vm1, %v442_v6  ;;  %v245_v12 = vld [vmem:[%s684_s8 + $0x10] sm:$0xff]  ;;  %v246_v13 = vld [vmem:[%s684_s8 + $0x18] sm:$0xff]  ;;  %v431_v15 = vld [vmem:[%s683_s7] ss:$0 sm:$0xff]  ;;  %vm254_vm4 = vcmask 261120  }
  0x15   :  { %461 = vmatpush3.msk.msra.mxu0 %vm153_vm2, %v58_v3  ;;  %462 = vmatprep.mubr.msk.f32.mxu0 %vm146_vm3, %v437_v7  ;;  %v480_v14 = vpack.c.bf16 %v246_v13, %v245_v12  ;;  %p347_p5 = scmp.lt.s32.totalorder %s678_s2, 1  ;;  %v339_v23 = vshrl.u32 %v338_v22, 7  ;;  %v432_v25 = vld [vmem:[%s685_s9] ss:$0 sm:$0xff] }
  0x16   :  { %477 = vmatprep.subr.bf16.mxu1 %v476_v10 }
  0x17   :  { %479 = vmatpush3.bf16.msra.mxu1 %v476_v10  ;;  %s689_s2 = smov (!%p347_p5, %s678_s2), 1  ;;  %v340_v24 = vadd.s32 8, %v339_v23 }
  0x18   :  { %481 = vmatprep.subr.bf16.mxu1 %v480_v14  ;;  %s349_s7 = sadd.s32 1, %s689_s2 }
  0x19   :  { %p421_p6 = scmp.ge.s32.totalorder %s677_s1, %s349_s7 }
  0x1b   :  { %483 = vmatpush3.bf16.msra.mxu1 %v480_v14 }
  0x1c   :  { %463 = vmatmul.mubr.msk.f32.vlgmr.msra.gmra.mrb[0].mxu0 %vm146_vm3, %v438_v11 }
  0xef   :  { %v464_v16 = vpop.f32.mrb[0].mxu0 }
  0xf0   :  { %v240_v17 = vadd.f32 %v464_v16, %v431_v15  ;;  %v223_v18 = vpop.f32.mrb[1].mxu0 }
  0xf1   :  { %v239_v19 = vadd.f32 %v431_v15, %v223_v18 }
  0xf2   :  { %v242_v21 = vmax.f32 %v240_v17, 0.0 }
  0xf3   :  { %v241_v20 = vmax.f32 %v239_v19, 0.0 }
  0xf5   :  { %473 = vmatprep.mubr.msk.f32.mxu1 %vm254_vm4, %v241_v20 }
  0xf6   :  { %474 = vmatmul.mubr.msk.f32.vlgmr.msra.gmra.mrb[0].mxu1 %vm254_vm4, %v242_v21 }
 0x1c7   :  { %422 = sbr.rel (%p421_p6) target bundleno = 491 (0x1eb), region = 58 }
 0x1c9   :  { %v475_v26 = vpop.f32.mrb[0].mxu1 }
 0x1ca   :  { %v333_v27 = vadd.f32 %v475_v26, %v432_v25  ;;  %v327_v28 = vpop.f32.mrb[1].mxu1 }
 0x1cb   :  { %v328_v29 = vadd.f32 %v432_v25, %v327_v28 }
 0x1cc   :  { %v337_v30 = vmax.f32 %v333_v27, 0.0 }
 0x1cd   :  { %v336_v31 = vmax.f32 %v328_v29, 0.0 }
 0x1ce LB: > { %s356_s9 = sld [smem:[#allocation4 + %s543_s1]]  ;;  %s357_s0 = sadd.s32 1, %s543_s1   ;;  %s543_s1 = sphi %s677_s1, %s687_s1  }
 0x1cf   : > { %s358_s20 = sld [smem:[#allocation4 + %s357_s0]]  ;;  %s380_s21 = scalar_lea.vmem [#allocation2], %s543_s1 }
 0x1d0   : > { %v381_v42 = vld [vmem:[%s380_s21] sm:$0x1]  ;;  %p352_p7 = scmp.ge.s32.totalorder %s357_s0, %s349_s7  ;;  %s687_s1 = smov %s357_s0 }
 0x1d4   : > { %v359_v32 = vstv %s356_s9 }
 0x1d5   : > { %vm360_vm5 = vcmp.ge.s32.totalorder %v339_v23, %v359_v32  ;;  %vm361_vm6 = vcmp.ge.s32.totalorder %v340_v24, %v359_v32  ;;  %v362_v33 = vstv %s358_s20 }
 0x1d6   : > { %vm363_vm7 = vcmp.lt.s32.totalorder %v339_v23, %v362_v33  ;;  %vm364_vm8 = vcmp.lt.s32.totalorder %v340_v24, %v362_v33 }
 0x1d7   : > { %vm365_vm9 = vmand %vm360_vm5, %vm363_vm7 }
 0x1d8   : > { %vm366_vm10 = vmand %vm361_vm6, %vm364_vm8  ;;  %v371_v34 = vsel %vm365_vm9, %v336_v31, -inf }
 0x1d9   : > { %v372_v35 = vsel %vm366_vm10, %v337_v30, -inf }
 0x1da   : > { %v373_v36 = vmax.f32 %v371_v34, %v372_v35 }
 0x1dc   : > { %v374_v37 = vrot.slane %v373_v36, 4 }
 0x1de   : > { %v375_v38 = vmax.f32 %v373_v36, %v374_v37 }
 0x1e0   : > { %v376_v39 = vrot.slane %v375_v38, 2 }
 0x1e2   : > { %v377_v40 = vmax.f32 %v375_v38, %v376_v39 }
 0x1e4   : > { %v378_v41 = vrot.slane %v377_v40, 1  ;;  %355 = sbr.rel (!%p352_p7) target bundleno = 462 (0x1ce), region = 64 }
 0x1e6   : > { %v379_v43 = vmax.f32 %v377_v40, %v378_v41 }
 0x1e8   : > { %v382_v44 = vmax.f32 %v381_v42, %v379_v43 }
 0x1ea   : > { %383 = vst [vmem:[%s380_s21] sm:$0x1] %v382_v44 }
 0x1eb PF:  { %s547_s22 = smov [#allocation7]  }
 0x1ec   :  { %s408_s6 = sshll.u32 %s547_s22, 4  ;;  %s409_s6 = int_to_ptr.vmem [resolvable:$true] %s408_s6 }
 0x1ed   :  { %s511_s23 = scalar_lea.vmem %s409_s6, 128  ;;  %p516_p9 = scmp.lt.s32.totalorder %s409_s6, %s409_s6 }
 0x1ee   :  { %p512_p8 = scmp.ne.s32.totalorder %s409_s6, %s511_s23  ;;  %p517_p10 = scmp.lt.s32.totalorder %s511_s23, %s511_s23 }
 0x1f0   :  { %p518_p11 = por %p517_p10, %p516_p9 }
 0x1f1   :  { %v387_v45 = vld [vmem:[#allocation2] sm:$0xff]  }
 0x1f2   :  { %395 = vst [vmem:[#allocation7] sm:$0xff] %v387_v45   ;;  %p519_p12 = pnand %p518_p11, %p512_p8 }
 0x1f4   :  { %522 = shalt.err (!%p519_p12)
}
 0x1f5   :  { %s523_s25 = scalar_lea.hbm %s686_s10, 128 }
 0x1f6   :  { %p524_p13 = scmp.ne.s32.totalorder %s686_s10, %s523_s25  ;;  %p527_p0 = scmp.lt.u32.totalorder %s523_s25, %s686_s10 }
 0x1f8   :  { %p529_p1 = pnand %p527_p0, %p524_p13 }
 0x1fa   :  { %532 = shalt.err (!%p529_p1)
}
 0x1fb   :  { %s548_s5 = smov 16   ;;  %s549_s27 = smov 1  }
 0x1fc   :  { %414 = dma.vmem_to_hbm [thread:$0]  %s409_s6, 128, %s686_s10, [#allocation8], %s548_s5, %s548_s5, %s549_s27  }
 0x1fd   :  { %539 = dma.done.wait [#allocation8], 128  }
 0x1fe   :  { %540 = vsyncadd [#allocation8], 4294967168 }
 0x1ff   :  { %418 = vsyncpa [#allocation8], 1 }

</bundles_post_ra>
